<compile_context>
chip_gen: v6e
topology: v6e:2x2x1
jax: 0.10.0
libtpu: 0.0.40
codegen_flags: <defaults>
</compile_context>

<pallas_src>
import math

import jax
import jax.numpy as jnp
from jax.experimental import pallas as pl
from jax.experimental.pallas import tpu as pltpu


def _round_up(n, m):
    return ((n + m - 1) // m) * m


def _bias_offsets(h1, h2, adim):
    """Sublane-aligned (multiple-of-8) start offsets for the packed biases."""
    o1 = 0
    o2 = _round_up(h1, 8)
    o3 = o2 + _round_up(h2, 8)
    total = o3 + _round_up(adim, 8)
    return (o1, o2, o3), total


def _pack_biases(b1, b2, b3):
    h1, h2, adim = b1.shape[0], b2.shape[0], b3.shape[0]
    (o1, o2, o3), total = _bias_offsets(h1, h2, adim)
    b_all = jnp.zeros((total, 1), jnp.float32)
    b_all = b_all.at[o1:o1 + h1].set(b1)
    b_all = b_all.at[o2:o2 + h2].set(b2)
    b_all = b_all.at[o3:o3 + adim].set(b3)
    return b_all


def _make_mean_kernel(h1, h2, adim, o1, o2, o3):
    """Kernel over one batch tile.  Lane axis = batch (lane-dense I/O)."""

    def kernel(x_ref, w1_ref, w2_ref, w3_ref, b_ref, mean_ref):
        # hidden layer 1: relu(W1 @ x^T + b1)
        h = jnp.dot(w1_ref[...], x_ref[...], preferred_element_type=jnp.float32)
        h = jnp.maximum(h + b_ref[o1:o1 + h1, :], 0.0)
        # hidden layer 2: relu(W2 @ h + b2)
        h = jnp.dot(w2_ref[...], h, preferred_element_type=jnp.float32)
        h = jnp.maximum(h + b_ref[o2:o2 + h2, :], 0.0)
        # action_mean head (single lane-dense output write)
        m = jnp.dot(w3_ref[...], h, preferred_element_type=jnp.float32)
        mean_ref[...] = m + b_ref[o3:o3 + adim, :]

    return kernel


def _pick_tile(batch, block_cols):
    """Batch-lane tile size: big (amortize per-step overhead), multiple of 128
    when it doesn't cover the whole batch, and >= 2 grid steps for large
    batches so v7x can use both TensorCores."""
    block_cols = max(128, _round_up(block_cols, 128))
    if batch > block_cols:
        return block_cols
    if batch >= 1024:
        return _round_up(pl.cdiv(batch, 2), 128)
    return batch  # single full-extent tile (full-dim blocks are always legal)


def _policy_mean_t(x_t, w1t, w2t, w3t, b_all, *, block_cols=32768):
    """x_t: (state_dim, batch) -> mean_t: (action_dim, batch)."""
    state_dim, batch = x_t.shape
    h1, h2, adim = w1t.shape[0], w2t.shape[0], w3t.shape[0]
    (o1, o2, o3), _ = _bias_offsets(h1, h2, adim)

    tb = _pick_tile(batch, block_cols)
    grid = (pl.cdiv(batch, tb),)

    def resident(arr):
        # Full-array block with constant block index: fetched once, stays in
        # VMEM across all grid steps.
        return pl.BlockSpec(arr.shape, lambda i: (0, 0))

    kernel = _make_mean_kernel(h1, h2, adim, o1, o2, o3)
    return pl.pallas_call(
        kernel,
        out_shape=jax.ShapeDtypeStruct((adim, batch), jnp.float32),
        grid=grid,
        in_specs=[
            pl.BlockSpec((state_dim, tb), lambda i: (0, i)),   # x^T batch tile
            resident(w1t), resident(w2t), resident(w3t), resident(b_all),
        ],
        out_specs=pl.BlockSpec((adim, tb), lambda i: (0, i)),
        compiler_params=pltpu.CompilerParams(
            # Independent batch tiles -> shard across TCs on v7x.
            dimension_semantics=("parallel",),
            # Raise v5e's 16 MiB scoped default; stay under v7x's 64 MiB VMEM.
            vmem_limit_bytes=48 * 1024 * 1024,
        ),
    )(x_t, w1t, w2t, w3t, b_all)


def policy_forward(x, params, *, block_cols=32768):
    """Policy.forward: returns (action_mean, action_log_std, action_std).

    x: (batch, state_dim), PyTorch layout.  The MLP runs in a batch-tiled
    Pallas kernel on the transposed (batch-on-lanes) layout; the wrapper-side
    transposes are pure layout plumbing.  action_log_std / action_std do not
    depend on x, so they are computed once on the (1, A) parameter row and
    broadcast here.
    """
    w1t, b1, w2t, b2, w3t, b3, log_std = params
    batch = x.shape[0]
    action_dim = w3t.shape[0]

    b_all = _pack_biases(b1, b2, b3)
    mean_t = _policy_mean_t(x.T, w1t, w2t, w3t, b_all, block_cols=block_cols)
    action_mean = mean_t.T

    action_log_std = jnp.broadcast_to(log_std, (batch, action_dim))
    action_std = jnp.broadcast_to(jnp.exp(log_std), (batch, action_dim))
    return action_mean, action_log_std, action_std


def init_policy_params(key, state_dim, action_dim, hidden_size=(32, 32),
                       log_std=0.0):
    """Deterministic init mimicking torch.nn.Linear (uniform +/- 1/sqrt(fan_in)).
    Weights are kept in PyTorch's native (out, in) layout; the action_mean
    weight is scaled by 0.1 and its bias zeroed, as in Policy.__init__.
    Biases are stored as (out, 1) columns."""
    dims = [state_dim] + list(hidden_size) + [action_dim]
    params = []
    keys = jax.random.split(key, 2 * (len(dims) - 1))
    for i in range(len(dims) - 1):
        fan_in, fan_out = dims[i], dims[i + 1]
        bound = 1.0 / math.sqrt(fan_in)
        w = jax.random.uniform(keys[2 * i], (fan_out, fan_in), jnp.float32,
                               minval=-bound, maxval=bound)
        b = jax.random.uniform(keys[2 * i + 1], (fan_out, 1), jnp.float32,
                               minval=-bound, maxval=bound)
        if i == len(dims) - 2:           # action_mean head
            w = w * 0.1
            b = b * 0.0
        params.extend([w, b])
    log_std_param = jnp.ones((1, action_dim), jnp.float32) * log_std
    return tuple(params) + (log_std_param,)


def policy_forward_ref(x, params):
    """Pure-JAX reference of Policy.forward for verification."""
    w1t, b1, w2t, b2, w3t, b3, log_std = params
    h = jnp.maximum(x @ w1t.T + b1[:, 0], 0.0)
    h = jnp.maximum(h @ w2t.T + b2[:, 0], 0.0)
    mean = h @ w3t.T + b3[:, 0]
    log_std_b = jnp.broadcast_to(log_std, mean.shape)
    return mean, log_std_b, jnp.exp(log_std_b)


def _check(out, ref):
    for o, r, tol in zip(out, ref, (1e-5, 1e-6, 1e-6)):
        assert o.shape == r.shape, (o.shape, r.shape)
        assert jnp.allclose(o, r, atol=tol, rtol=1e-5), float(jnp.max(jnp.abs(o - r)))


if __name__ == "__main__":
    key = jax.random.PRNGKey(0)
    k_param, k_x1, k_x2, k_x3 = jax.random.split(key, 4)

    state_dim, action_dim = 16, 8
    hidden_size = (32, 32)
    params = init_policy_params(k_param, state_dim, action_dim,
                                hidden_size=hidden_size, log_std=0.0)

    # 1) Small single-tile case (batch=8 -> one grid step, full-extent block).
    x_small = jax.random.normal(k_x1, (8, state_dim), jnp.float32)
    out = policy_forward(x_small, params)
    jax.block_until_ready(out)
    _check(out, policy_forward_ref(x_small, params))

    # 2) Multi-step grid with a ragged final tile (300 rows, 128-lane tiles:
    #    3 grid steps, last block writes only 44 valid columns).
    x_rag = jax.random.normal(k_x2, (300, state_dim), jnp.float32)
    out = policy_forward(x_rag, params, block_cols=128)
    jax.block_until_ready(out)
    _check(out, policy_forward_ref(x_rag, params))

    # 3) Larger batch exercising the >=2-step (megacore) tile split.
    x_big = jax.random.normal(k_x3, (2048, state_dim), jnp.float32)
    out = policy_forward(x_big, params)
    jax.block_until_ready(out)
    _check(out, policy_forward_ref(x_big, params))

    print("KERNEL_OK")
</pallas_src>

<mosaic_0001>
module attributes {stable_mosaic.version = 11 : i64} {
  func.func @kernel(%arg0: i32, %arg1: memref<16x8xf32, #tpu.memory_space<vmem>>, %arg2: memref<32x16xf32, #tpu.memory_space<vmem>>, %arg3: memref<32x32xf32, #tpu.memory_space<vmem>>, %arg4: memref<8x32xf32, #tpu.memory_space<vmem>>, %arg5: memref<72x1xf32, #tpu.memory_space<vmem>>, %arg6: memref<8x8xf32, #tpu.memory_space<vmem>>) attributes {dimension_semantics = [#tpu.dimension_semantics<parallel>], iteration_bounds = array<i64: 1>, scalar_prefetch = 0 : i64, scratch_operands = 0 : i64, tpu.core_type = #tpu.core_type<tc>, window_params = [{transform_indices = @transform_0, window_bounds = array<i64: 16, 8>}, {pipeline_mode = #tpu.pipeline_mode<synchronous>, transform_indices = @transform_1, window_bounds = array<i64: 32, 16>}, {pipeline_mode = #tpu.pipeline_mode<synchronous>, transform_indices = @transform_2, window_bounds = array<i64: 32, 32>}, {pipeline_mode = #tpu.pipeline_mode<synchronous>, transform_indices = @transform_3, window_bounds = array<i64: 8, 32>}, {pipeline_mode = #tpu.pipeline_mode<synchronous>, transform_indices = @transform_4, window_bounds = array<i64: 72, 1>}, {transform_indices = @transform_5, window_bounds = array<i64: 8, 8>}]} {
    %c0 = arith.constant 0 : index
    %c0_0 = arith.constant 0 : index
    %0 = vector.load %arg2[%c0, %c0_0] : memref<32x16xf32, #tpu.memory_space<vmem>>, vector<32x16xf32>
    %c0_1 = arith.constant 0 : index
    %c0_2 = arith.constant 0 : index
    %1 = vector.load %arg1[%c0_1, %c0_2] : memref<16x8xf32, #tpu.memory_space<vmem>>, vector<16x8xf32>
    %cst = arith.constant dense<0.000000e+00> : vector<32x8xf32>
    %2 = tpu.matmul %0, %1, %cst {dimension_numbers = #tpu.dot_dimension_numbers<[1], [0], [0], [1], [0, 0, 1, 1], [], []>} : vector<32x16xf32>, vector<16x8xf32>, vector<32x8xf32> -> vector<32x8xf32>
    %c0_3 = arith.constant 0 : index
    %c0_4 = arith.constant 0 : index
    %3 = vector.load %arg5[%c0_3, %c0_4] : memref<72x1xf32, #tpu.memory_space<vmem>>, vector<32x1xf32>
    %4 = vector.broadcast %3 : vector<32x1xf32> to vector<32x8xf32>
    %5 = arith.addf %2, %4 : vector<32x8xf32>
    %cst_5 = arith.constant 0.000000e+00 : f32
    %6 = vector.broadcast %cst_5 : f32 to vector<32x8xf32>
    %7 = arith.maximumf %5, %6 : vector<32x8xf32>
    %c0_6 = arith.constant 0 : index
    %c0_7 = arith.constant 0 : index
    %8 = vector.load %arg3[%c0_6, %c0_7] : memref<32x32xf32, #tpu.memory_space<vmem>>, vector<32x32xf32>
    %cst_8 = arith.constant dense<0.000000e+00> : vector<32x8xf32>
    %9 = tpu.matmul %8, %7, %cst_8 {dimension_numbers = #tpu.dot_dimension_numbers<[1], [0], [0], [1], [0, 0, 1, 1], [], []>} : vector<32x32xf32>, vector<32x8xf32>, vector<32x8xf32> -> vector<32x8xf32>
    %c32 = arith.constant 32 : index
    %c0_9 = arith.constant 0 : index
    %10 = vector.load %arg5[%c32, %c0_9] : memref<72x1xf32, #tpu.memory_space<vmem>>, vector<32x1xf32>
    %11 = vector.broadcast %10 : vector<32x1xf32> to vector<32x8xf32>
    %12 = arith.addf %9, %11 : vector<32x8xf32>
    %cst_10 = arith.constant 0.000000e+00 : f32
    %13 = vector.broadcast %cst_10 : f32 to vector<32x8xf32>
    %14 = arith.maximumf %12, %13 : vector<32x8xf32>
    %c0_11 = arith.constant 0 : index
    %c0_12 = arith.constant 0 : index
    %15 = vector.load %arg4[%c0_11, %c0_12] : memref<8x32xf32, #tpu.memory_space<vmem>>, vector<8x32xf32>
    %cst_13 = arith.constant dense<0.000000e+00> : vector<8x8xf32>
    %16 = tpu.matmul %15, %14, %cst_13 {dimension_numbers = #tpu.dot_dimension_numbers<[1], [0], [0], [1], [0, 0, 1, 1], [], []>} : vector<8x32xf32>, vector<32x8xf32>, vector<8x8xf32> -> vector<8x8xf32>
    %c64 = arith.constant 64 : index
    %c0_14 = arith.constant 0 : index
    %17 = vector.load %arg5[%c64, %c0_14] : memref<72x1xf32, #tpu.memory_space<vmem>>, vector<8x1xf32>
    %18 = vector.broadcast %17 : vector<8x1xf32> to vector<8x8xf32>
    %19 = arith.addf %16, %18 : vector<8x8xf32>
    %c0_15 = arith.constant 0 : index
    %c0_16 = arith.constant 0 : index
    %20 = vector.load %arg6[%c0_15, %c0_16] : memref<8x8xf32, #tpu.memory_space<vmem>>, vector<8x8xf32>
    tpu.vector_store %arg6[%c0_15, %c0_16], %19 {strides = array<i32>} : memref<8x8xf32, #tpu.memory_space<vmem>>, vector<8x8xf32>,
    return
  }
  func.func @transform_0(%arg0: i32) -> (i32, i32) {
    %c0_i32 = arith.constant 0 : i32
    %c0_i32_0 = arith.constant 0 : i32
    return %c0_i32, %arg0 : i32, i32
  }
  func.func @transform_1(%arg0: i32) -> (i32, i32) {
    %c0_i32 = arith.constant 0 : i32
    %c0_i32_0 = arith.constant 0 : i32
    %c0_i32_1 = arith.constant 0 : i32
    return %c0_i32, %c0_i32_0 : i32, i32
  }
  func.func @transform_2(%arg0: i32) -> (i32, i32) {
    %c0_i32 = arith.constant 0 : i32
    %c0_i32_0 = arith.constant 0 : i32
    %c0_i32_1 = arith.constant 0 : i32
    return %c0_i32, %c0_i32_0 : i32, i32
  }
  func.func @transform_3(%arg0: i32) -> (i32, i32) {
    %c0_i32 = arith.constant 0 : i32
    %c0_i32_0 = arith.constant 0 : i32
    %c0_i32_1 = arith.constant 0 : i32
    return %c0_i32, %c0_i32_0 : i32, i32
  }
  func.func @transform_4(%arg0: i32) -> (i32, i32) {
    %c0_i32 = arith.constant 0 : i32
    %c0_i32_0 = arith.constant 0 : i32
    %c0_i32_1 = arith.constant 0 : i32
    return %c0_i32, %c0_i32_0 : i32, i32
  }
  func.func @transform_5(%arg0: i32) -> (i32, i32) {
    %c0_i32 = arith.constant 0 : i32
    %c0_i32_0 = arith.constant 0 : i32
    return %c0_i32, %arg0 : i32, i32
  }
}

</mosaic_0001>

<bundles_post_ra>
// kernel: tpu_custom_call.1
= control target key start
LH: loop header
LB: loop body
LE: loop exit
PB: predicated region body
PF: predicated region fallthrough
CT: control target
= control target key end

     0   :  { %vm51_vm0 = vcmask 130048   ;;  %v470_v4 = vmov 0   ;;  %s576_s0 = inlined_call_operand.vmem [shape: f32[16,8], index: 0, kind: input, shape index: {}]   ;;  %s577_s1 = inlined_call_operand.vmem [shape: f32[32,16], index: 1, kind: input, shape index: {}]   ;;  %s578_s2 = inlined_call_operand.vmem [shape: f32[32,32], index: 2, kind: input, shape index: {}]   ;;  %s579_s3 = inlined_call_operand.vmem [shape: f32[8,32], index: 3, kind: input, shape index: {}]   ;;  %s580_s4 = inlined_call_operand.vmem [shape: f32[72,1], index: 4, kind: input, shape index: {}]   ;;  %s581_s5 = inlined_call_operand.hbm [shape: f32[8,8], index: 5, kind: output, shape index: {}]  }
   0x1   :  { %v26_v0 = vld [vmem:[%s576_s0 + $0x8] sm:$0xff]  ;;  %v25_v1 = vld [vmem:[%s576_s0] sm:$0xff]  ;;  %446 = vset.pattern.permute.xlu0 %v470_v4  ;;  %v30_v5 = vld [vmem:[%s580_s4 + $0x18] sm:$0xff]  ;;  %447 = vset.pattern.permute.xlu1 %v470_v4 }
   0x2   :  { %v21_v2 = vld [vmem:[%s577_s1] sm:$0xff]  ;;  %407 = vmatprep.subr.mxu0 %v26_v0  ;;  %v22_v3 = vld [vmem:[%s577_s1 + $0x8] sm:$0xff]  ;;  %v23_v6 = vld [vmem:[%s577_s1 + $0x10] sm:$0xff]  ;;  %48 = vperm.xlu0 %446, %v30_v5  }
   0x3   :  { %411 = vmatprep.mubr.msk.f32.mxu0 %vm51_vm0, %v21_v2  ;;  %408 = vmatpush3.msra.mxu0 %v26_v0  ;;  %v28_v7 = vld [vmem:[%s580_s4 + $0x8] sm:$0xff]  ;;  %v29_v8 = vld [vmem:[%s580_s4 + $0x10] sm:$0xff] }
   0x4   :  { %409 = vmatprep.subr.mxu0 %v25_v1  ;;  %38 = vperm.xlu1 %447, %v28_v7  }
   0x5   :  { %410 = vmatpush3.msra.mxu0 %v25_v1 }
   0x6   :  { %412 = vmatmul.mubr.msk.f32.vlgmr.msra.gmra.mxu0 %vm51_vm0, %v22_v3 }
   0x7   :  { %10 = vsyncpa [#allocation3], 0  ;;  %414 = vmatprep.mubr.msk.f32.mxu0 %vm51_vm0, %v23_v6  ;;  %v24_v9 = vld [vmem:[%s577_s1 + $0x18] sm:$0xff]  ;;  %v27_v10 = vld [vmem:[%s580_s4] sm:$0xff]  ;;  %43 = vperm.xlu0 %446, %v29_v8   ;;  %vm181_vm1 = vcmask 261120   ;;  %v471_v36 = vmov 0.0  }
   0x8   :  { %v160_v11 = vld [vmem:[%s580_s4 + $0x38] sm:$0xff]  ;;  %33 = vperm.xlu1 %447, %v27_v10   ;;  %v159_v12 = vld [vmem:[%s580_s4 + $0x30] sm:$0xff]  ;;  %v158_v13 = vld [vmem:[%s580_s4 + $0x28] sm:$0xff]  ;;  %431 = vmatprep.subr.mxu0 %v471_v36  ;;  %vm472_vm2 = vmmov 0   ;;  %s473_s28 = smov [#allocation2]   ;;  %vm363_vm3 = vcmask 64512  }
   0x9   :  { %v157_v14 = vld [vmem:[%s580_s4 + $0x20] sm:$0xff]  ;;  %v154_v33 = vld [vmem:[%s578_s2 + $0x8] sm:$0xff]  ;;  %v155_v34 = vld [vmem:[%s578_s2 + $0x10] sm:$0xff]  ;;  %s371_s29 = sshll.u32 %s473_s28, 4  ;;  %s372_s29 = int_to_ptr.vmem [resolvable:$true] %s371_s29 }
   0xa   :  { %415 = vmatmul.mubr.msk.f32.gmra.mxu0 %vm51_vm0, %v24_v9  ;;  %v284_v15 = vld [vmem:[%s580_s4 + $0x40] sm:$0xff]  ;;  %v156_v35 = vld [vmem:[%s578_s2 + $0x18] sm:$0xff]  ;;  %s448_s30 = scalar_lea.vmem %s372_s29, 128  ;;  %p453_p1 = scmp.lt.s32.totalorder %s372_s29, %s372_s29 }
   0xb   :  { %178 = vperm.xlu0 %446, %v160_v11   ;;  %v153_v16 = vld [vmem:[%s578_s2] sm:$0xff]  ;;  %439 = vmatprep.mubr.msk.f32.mxu0 %vm472_vm2, %v471_v36  ;;  %p449_p0 = scmp.ne.s32.totalorder %s372_s29, %s448_s30  ;;  %p454_p2 = scmp.lt.s32.totalorder %s448_s30, %s448_s30 }
   0xc   :  { %173 = vperm.xlu1 %447, %v159_v12   ;;  %425 = vmatprep.mubr.msk.f32.mxu1 %vm181_vm1, %v153_v16  ;;  %v283_v53 = vld [vmem:[%s579_s3] sm:$0xff] }
   0xd   :  { %p455_p3 = por %p454_p2, %p453_p1 }
   0xf   :  { %168 = vperm.xlu0 %446, %v158_v13   ;;  %p456_p4 = pnand %p455_p3, %p449_p0 }
  0x10   :  { %163 = vperm.xlu1 %447, %v157_v14  }
  0x13   :  { %287 = vperm.xlu0 %446, %v284_v15  }
  0x7d   :  { %v49_v17 = vpop.permute.xlu0 %48 }
  0x7f   :  { %v39_v19 = vpop.permute.xlu1 %38 }
  0x82   :  { %v44_v23 = vpop.permute.xlu0 %43 }
  0x83   :  { %v34_v28 = vpop.permute.xlu1 %33 }
  0x86   :  { %v179_v37 = vpop.permute.xlu0 %178 }
  0x87   :  { %v174_v39 = vpop.permute.xlu1 %173 }
  0x8a   :  { %v169_v43 = vpop.permute.xlu0 %168 }
  0x8b   :  { %v164_v48 = vpop.permute.xlu1 %163 }
  0x8e   :  { %v288_v54 = vpop.permute.xlu0 %287 }
  0xc6   :  { %v413_v18 = vpop.f32.mrf.mxu0 }
  0xc7   :  { %v136_v25 = vadd.f32 %v413_v18, %v39_v19 }
  0xc8   :  { %v130_v20 = vpop.f32.mrf.mxu0 }
  0xc9   :  { %v131_v29 = vadd.f32 %v130_v20, %v34_v28  ;;  %v150_v31 = vmax.f32 %v136_v25, 0.0 }
  0xca   :  { %v416_v21 = vpop.f32.mrf.mxu0 }
  0xcb   :  { %v146_v22 = vadd.f32 %v416_v21, %v49_v17  ;;  %v149_v32 = vmax.f32 %v131_v29, 0.0 }
  0xcc   :  { %v140_v24 = vpop.f32.mrf.mxu0 }
  0xcd   :  { %v152_v26 = vmax.f32 %v146_v22, 0.0  ;;  %v141_v27 = vadd.f32 %v140_v24, %v44_v23 }
  0xcf   :  { %v151_v30 = vmax.f32 %v141_v27, 0.0  ;;  %417 = vmatprep.subr.mxu1 %v152_v26 }
  0xd0   :  { %418 = vmatpush3.msra.mxu1 %v152_v26 }
  0xd1   :  { %419 = vmatprep.subr.mxu1 %v151_v30 }
  0xd2   :  { %420 = vmatpush3.msra.mxu1 %v151_v30 }
  0xd3   :  { %421 = vmatprep.subr.mxu1 %v150_v31 }
  0xd4   :  { %422 = vmatpush3.msra.mxu1 %v150_v31 }
  0xd5   :  { %423 = vmatprep.subr.mxu1 %v149_v32 }
  0xd6   :  { %424 = vmatpush3.msra.mxu1 %v149_v32 }
  0xd7   :  { %426 = vmatmul.mubr.msk.f32.vlgmr.msra.gmra.mxu1 %vm181_vm1, %v154_v33 }
  0xd8   :  { %428 = vmatprep.mubr.msk.f32.mxu1 %vm181_vm1, %v155_v34 }
  0xdb   :  { %429 = vmatmul.mubr.msk.f32.gmra.mxu1 %vm181_vm1, %v156_v35 }
 0x197   :  { %v427_v38 = vpop.f32.mrf.mxu1 }
 0x198   :  { %v266_v45 = vadd.f32 %v427_v38, %v169_v43 }
 0x199   :  { %v260_v40 = vpop.f32.mrf.mxu1 }
 0x19a   :  { %v261_v49 = vadd.f32 %v260_v40, %v164_v48  ;;  %v280_v51 = vmax.f32 %v266_v45, 0.0 }
 0x19b   :  { %v430_v41 = vpop.f32.mrf.mxu1 }
 0x19c   :  { %v276_v42 = vadd.f32 %v430_v41, %v179_v37  ;;  %v279_v52 = vmax.f32 %v261_v49, 0.0 }
 0x19d   :  { %v270_v44 = vpop.f32.mrf.mxu1 }
 0x19e   :  { %v282_v46 = vmax.f32 %v276_v42, 0.0  ;;  %v271_v47 = vadd.f32 %v270_v44, %v174_v39 }
 0x1a0   :  { %v281_v50 = vmax.f32 %v271_v47, 0.0  ;;  %432 = vmatpush3.msra.mxu0 %v282_v46 }
 0x1a1   :  { %433 = vmatprep.subr.mxu0 %v471_v36 }
 0x1a2   :  { %434 = vmatpush3.msra.mxu0 %v281_v50 }
 0x1a3   :  { %435 = vmatprep.subr.mxu0 %v471_v36 }
 0x1a4   :  { %436 = vmatpush3.msra.mxu0 %v280_v51 }
 0x1a5   :  { %437 = vmatprep.subr.mxu0 %v471_v36 }
 0x1a6   :  { %438 = vmatpush3.msra.mxu0 %v279_v52 }
 0x1a7   :  { %440 = vmatmul.mubr.msk.f32.vlgmr.msra.gmra.mxu0 %vm181_vm1, %v283_v53 }
 0x267   :  { %v359_v55 = vpop.f32.mrf.mxu0 }
 0x268   :  { %v360_v56 = vadd.f32 %v359_v55, %v288_v54 }
 0x269   :  { %v441_v57 = vpop.f32.mrf.mxu0 }
 0x26a   :  { %364 = vst.msk [vmem:[#allocation2] sm:$0xff] %vm363_vm3, %v360_v56 }
 0x26b   :  { %459 = shalt.err (!%p456_p4)
}
 0x26c   :  { %374 = dma.vmem_to_hbm [thread:$0]  %s372_s29, 128, %s581_s5, [#allocation3]  }
 0x26d   :  { %468 = dma.done.wait [#allocation3], 128  }
 0x26e   :  { %469 = vsyncadd [#allocation3], 4294967168 }
 0x26f   :  { %378 = vsyncpa [#allocation3], 1 }

</bundles_post_ra>
